<compile_context>
chip_gen: v6e
topology: v6e:2x2x1
jax: 0.10.0
libtpu: 0.0.40
codegen_flags: <defaults>
</compile_context>

<pallas_src>
import jax
import jax.numpy as jnp
from jax import lax
from jax.experimental import pallas as pl
from jax.experimental.pallas import tpu as pltpu

_INV_SQRT2 = 0.7071067811865476


def _ff_kernel(x_ref, w1a_ref, b1a_ref, w1b_ref, b1b_ref, w2_ref, b2_ref,
               o_ref, acc_ref):
    h_idx = pl.program_id(1)

    @pl.when(h_idx == 0)
    def _():
        acc_ref[...] = jnp.zeros_like(acc_ref)

    x = x_ref[...]  # working dtype -> MXU at full rate

    # First linear, computed directly as the two GEGLU halves (f32 accumulate).
    a = jnp.dot(x, w1a_ref[...], preferred_element_type=jnp.float32)
    a += b1a_ref[...].astype(jnp.float32)
    g = jnp.dot(x, w1b_ref[...], preferred_element_type=jnp.float32)
    g += b1b_ref[...].astype(jnp.float32)

    # Exact (erf) GELU on the gates (f32), matching torch F.gelu default.
    # TODO(synk): tanh-approx / bf16 gate math (EUP / packed-VPU) if exact
    # parity with torch is not required.
    gelu_g = 0.5 * g * (1.0 + lax.erf(g * _INV_SQRT2))
    geglu = (a * gelu_g).astype(w2_ref.dtype)

    # Second linear: accumulate this H-chunk's partial product.
    acc_ref[...] += jnp.dot(geglu, w2_ref[...], preferred_element_type=jnp.float32)

    @pl.when(h_idx == pl.num_programs(1) - 1)
    def _():
        o_ref[...] = (acc_ref[...] + b2_ref[...].astype(jnp.float32)).astype(o_ref.dtype)


def _round_up(x, m):
    return (x + m - 1) // m * m


def _cdiv(a, b):
    return (a + b - 1) // b


def _tpu_generation():
    kind = ""
    try:
        kind = jax.devices()[0].device_kind.lower()
    except Exception:
        pass
    if "v5 lite" in kind or "v5e" in kind or "v5lite" in kind:
        return "v5e"
    if "v7" in kind:
        return "v7x"
    if "v6" in kind:
        return "v6e"
    if "v5" in kind:   # v5p etc. -> treat conservatively like v5e tiles
        return "v5e"
    return "v6e"


def _vmem_physical_bytes(gen):
    try:
        info = pltpu.get_tpu_info()
        cap = getattr(info, "vmem_capacity_bytes", None)
        if cap:
            return int(cap)
    except Exception:
        pass
    return (64 if gen == "v7x" else 128) * (1 << 20)


def feed_forward(x, w1, b1, w2, b2, *, tn=None, th=None, compute_dtype=None):
    """GEGLU feed-forward.  x: [..., D]; w1: [D, 2H]; b1: [2H]; w2: [H, D]; b2: [D]."""
    orig_shape = x.shape
    out_dtype = x.dtype
    d = orig_shape[-1]

    work_dtype = jnp.dtype(compute_dtype) if compute_dtype is not None else x.dtype
    x2 = x.reshape(-1, d).astype(work_dtype)
    w1 = w1.astype(work_dtype)
    w2 = w2.astype(work_dtype)

    n = x2.shape[0]
    two_h = w1.shape[1]
    h = two_h // 2
    assert w2.shape == (h, d)

    # Split w1/b1 into the two GEGLU halves (chunk 0 = value, chunk 1 = gates).
    w1_a, w1_b = w1[:, :h], w1[:, h:]
    b1_a, b1_b = b1[:h], b1[h:]

    isz = jnp.dtype(work_dtype).itemsize
    pack = {4: 8, 2: 16, 1: 32}.get(isz, 8)      # sublane packing for dtype

    gen = _tpu_generation()
    if tn is None:
        tn = {"v5e": 384, "v6e": 768, "v7x": 512}.get(gen, 512)
    if th is None:
        th = 512

    d_pad = _round_up(d, 128)
    th = max(128, min(th, _round_up(h, 128)))
    tn = max(pack, min(_round_up(tn, pack), _round_up(n, pack)))

    # v7x: the "parallel" N axis shards across the two TensorCores; make sure
    # there are at least two i-tiles when N allows it.
    if gen == "v7x" and _round_up(n, pack) >= 2 * pack and _cdiv(n, tn) < 2:
        tn = max(pack, _round_up(_cdiv(n, 2), pack))

    # VMEM budget (per pipeline step): double-buffered input/weight/output
    # tiles + f32 accumulator + the [TN,TH] f32 elementwise temporaries.
    def _tile_bytes(tn_, th_):
        return (2 * tn_ * d_pad * isz                 # x tile (2x buffered)
                + 2 * 2 * d_pad * th_ * isz           # w1a + w1b (2x buffered)
                + 2 * th_ * d_pad * isz               # w2 (2x buffered)
                + 2 * (2 * th_ + d_pad) * isz         # biases (2x buffered)
                + 2 * tn_ * d_pad * isz               # output tile (2x buffered)
                + tn_ * d_pad * 4                     # f32 accumulator scratch
                + 4 * tn_ * th_ * 4)                  # a/g/gelu_g/geglu temps

    phys = _vmem_physical_bytes(gen)
    headroom = 8 * (1 << 20)                          # Mosaic internal scratch
    vmem_budget = min(phys - headroom,
                      (110 << 20) if phys > (64 << 20) else (56 << 20))

    # Shrink tiles until the budget fits (keeps lane-dense d_pad untouched).
    while _tile_bytes(tn, th) > vmem_budget and (tn > pack or th > 128):
        if tn >= th and tn > pack:
            tn = max(pack, _round_up(tn // 2, pack))
        elif th > 128:
            th = max(128, _round_up(th // 2, 128))
        else:
            break

    n_pad = _round_up(n, tn)
    h_pad = _round_up(h, th)
    num_k = h_pad // th
    grid = (n_pad // tn, num_k)

    def pad2(arr, r, c):
        return jnp.pad(arr, ((0, r - arr.shape[0]), (0, c - arr.shape[1])))

    x_p = pad2(x2, n_pad, d_pad)
    w1a_p = pad2(w1_a, d_pad, h_pad)
    w1b_p = pad2(w1_b, d_pad, h_pad)
    w2_p = pad2(w2, h_pad, d_pad)
    b1a_p = pad2(b1_a.reshape(1, h), 1, h_pad)
    b1b_p = pad2(b1_b.reshape(1, h), 1, h_pad)
    b2_p = pad2(b2.reshape(1, d), 1, d_pad)

    # Pre-block w1a/w1b so each (d_pad, th) k-chunk is contiguous in HBM.
    w1a_blk = w1a_p.reshape(d_pad, num_k, th).transpose(1, 0, 2)  # [num_k, D, TH]
    w1b_blk = w1b_p.reshape(d_pad, num_k, th).transpose(1, 0, 2)

    vmem_limit = int(min(vmem_budget,
                         max(int(_tile_bytes(tn, th) * 1.3), 32 * (1 << 20))))

    def _nbytes(a):
        return a.size * a.dtype.itemsize

    n_tiles = n_pad // tn
    weight_bytes = (_nbytes(w1a_blk) + _nbytes(w1b_blk) + _nbytes(w2_p)
                    + _nbytes(b1a_p) + _nbytes(b1b_p) + _nbytes(b2_p))
    cost = pl.CostEstimate(
        flops=6 * n * d * h,                       # 2*N*D*2H + 2*N*H*D
        transcendentals=n * h,                     # erf on the gates
        bytes_accessed=int(_nbytes(x_p) + n_pad * d_pad * out_dtype.itemsize
                           + weight_bytes * n_tiles))

    out = pl.pallas_call(
        _ff_kernel,
        out_shape=jax.ShapeDtypeStruct((n_pad, d_pad), out_dtype),
        grid_spec=pltpu.PrefetchScalarGridSpec(
            num_scalar_prefetch=0,
            grid=grid,
            in_specs=[
                pl.BlockSpec((tn, d_pad), lambda i, k: (i, 0)),          # x
                pl.BlockSpec((None, d_pad, th), lambda i, k: (k, 0, 0)),  # w1_a (pre-blocked)
                pl.BlockSpec((1, th), lambda i, k: (0, k)),              # b1_a
                pl.BlockSpec((None, d_pad, th), lambda i, k: (k, 0, 0)),  # w1_b (pre-blocked)
                pl.BlockSpec((1, th), lambda i, k: (0, k)),              # b1_b
                pl.BlockSpec((th, d_pad), lambda i, k: (k, 0)),          # w2
                pl.BlockSpec((1, d_pad), lambda i, k: (0, 0)),           # b2
            ],
            out_specs=pl.BlockSpec((tn, d_pad), lambda i, k: (i, 0)),
            scratch_shapes=[pltpu.VMEM((tn, d_pad), jnp.float32)],
        ),
        compiler_params=pltpu.CompilerParams(
            dimension_semantics=("parallel", "arbitrary"),
            vmem_limit_bytes=vmem_limit),
        cost_estimate=cost,
    )(x_p, w1a_blk, b1a_p, w1b_blk, b1b_p, w2_p, b2_p)

    return out[:n, :d].reshape(orig_shape)


def _reference(x, w1, b1, w2, b2):
    hid = jnp.dot(x, w1) + b1
    a, g = jnp.split(hid, 2, axis=-1)
    geglu = a * jax.nn.gelu(g, approximate=False)
    return jnp.dot(geglu, w2) + b2


if __name__ == "__main__":
    key = jax.random.PRNGKey(0)
    B, S, dim, mult = 2, 8, 32, 1
    hidden = dim * mult

    k_x, k_w1, k_b1, k_w2, k_b2 = jax.random.split(key, 5)

    x = jax.random.normal(k_x, (B, S, dim), dtype=jnp.float32)

    # Deterministic parameter init (uniform, like PyTorch Linear default bounds).
    bound1 = 1.0 / jnp.sqrt(dim)
    w1 = jax.random.uniform(k_w1, (dim, hidden * 2), jnp.float32, -bound1, bound1)
    b1 = jax.random.uniform(k_b1, (hidden * 2,), jnp.float32, -bound1, bound1)
    bound2 = 1.0 / jnp.sqrt(hidden)
    w2 = jax.random.uniform(k_w2, (hidden, dim), jnp.float32, -bound2, bound2)
    b2 = jax.random.uniform(k_b2, (dim,), jnp.float32, -bound2, bound2)

    out = feed_forward(x, w1, b1, w2, b2)
    jax.block_until_ready(out)

    ref = _reference(x, w1, b1, w2, b2)
    assert out.shape == x.shape
    assert jnp.allclose(out, ref, atol=1e-5, rtol=1e-5), (
        f"max abs err: {jnp.max(jnp.abs(out - ref))}")

    print("KERNEL_OK")
</pallas_src>

<mosaic_0001>
module attributes {stable_mosaic.version = 11 : i64} {
  func.func @_ff_kernel(%arg0: i32, %arg1: i32, %arg2: memref<16x128xf32, #tpu.memory_space<vmem>>, %arg3: memref<1x128x128xf32, #tpu.memory_space<vmem>>, %arg4: memref<1x128xf32, #tpu.memory_space<vmem>>, %arg5: memref<1x128x128xf32, #tpu.memory_space<vmem>>, %arg6: memref<1x128xf32, #tpu.memory_space<vmem>>, %arg7: memref<128x128xf32, #tpu.memory_space<vmem>>, %arg8: memref<1x128xf32, #tpu.memory_space<vmem>>, %arg9: memref<16x128xf32, #tpu.memory_space<vmem>>, %arg10: memref<16x128xf32, #tpu.memory_space<vmem>>) attributes {dimension_semantics = [#tpu.dimension_semantics<parallel>, #tpu.dimension_semantics<arbitrary>], iteration_bounds = array<i64: 1, 1>, scalar_prefetch = 0 : i64, scratch_operands = 1 : i64, tpu.core_type = #tpu.core_type<tc>, window_params = [{transform_indices = @transform_0, window_bounds = array<i64: 16, 128>}, {transform_indices = @transform_1, window_bounds = array<i64: 1, 128, 128>}, {transform_indices = @transform_2, window_bounds = array<i64: 1, 128>}, {transform_indices = @transform_3, window_bounds = array<i64: 1, 128, 128>}, {transform_indices = @transform_4, window_bounds = array<i64: 1, 128>}, {transform_indices = @transform_5, window_bounds = array<i64: 128, 128>}, {pipeline_mode = #tpu.pipeline_mode<synchronous>, transform_indices = @transform_6, window_bounds = array<i64: 1, 128>}, {transform_indices = @transform_7, window_bounds = array<i64: 16, 128>}]} {
    %c0_i32 = arith.constant 0 : i32
    %0 = arith.cmpi eq, %arg1, %c0_i32 : i32
    %1 = arith.extui %0 : i1 to i32
    %c0_i32_0 = arith.constant 0 : i32
    %2 = arith.cmpi ne, %1, %c0_i32_0 : i32
    scf.if %2 {
      %cst_25 = arith.constant 0.000000e+00 : f32
      %33 = vector.broadcast %cst_25 : f32 to vector<16x128xf32>
      %c0_26 = arith.constant 0 : index
      %c0_27 = arith.constant 0 : index
      %34 = vector.load %arg10[%c0_26, %c0_27] : memref<16x128xf32, #tpu.memory_space<vmem>>, vector<16x128xf32>
      tpu.vector_store %arg10[%c0_26, %c0_27], %33 {strides = array<i32>} : memref<16x128xf32, #tpu.memory_space<vmem>>, vector<16x128xf32>,
    } else {
    }
    %c0 = arith.constant 0 : index
    %c0_1 = arith.constant 0 : index
    %3 = vector.load %arg2[%c0, %c0_1] : memref<16x128xf32, #tpu.memory_space<vmem>>, vector<16x128xf32>
    %c0_2 = arith.constant 0 : index
    %c0_3 = arith.constant 0 : index
    %c0_4 = arith.constant 0 : index
    %4 = vector.load %arg3[%c0_2, %c0_3, %c0_4] : memref<1x128x128xf32, #tpu.memory_space<vmem>>, vector<1x128x128xf32>
    %5 = vector.shape_cast %4 : vector<1x128x128xf32> to vector<128x128xf32>
    %cst = arith.constant dense<0.000000e+00> : vector<16x128xf32>
    %6 = tpu.matmul %3, %5, %cst {dimension_numbers = #tpu.dot_dimension_numbers<[1], [0], [0], [1], [0, 0, 1, 1], [], []>} : vector<16x128xf32>, vector<128x128xf32>, vector<16x128xf32> -> vector<16x128xf32>
    %c0_5 = arith.constant 0 : index
    %c0_6 = arith.constant 0 : index
    %7 = vector.load %arg4[%c0_5, %c0_6] : memref<1x128xf32, #tpu.memory_space<vmem>>, vector<1x128xf32>
    %8 = vector.broadcast %7 : vector<1x128xf32> to vector<16x128xf32>
    %9 = arith.addf %6, %8 : vector<16x128xf32>
    %c0_7 = arith.constant 0 : index
    %c0_8 = arith.constant 0 : index
    %c0_9 = arith.constant 0 : index
    %10 = vector.load %arg5[%c0_7, %c0_8, %c0_9] : memref<1x128x128xf32, #tpu.memory_space<vmem>>, vector<1x128x128xf32>
    %11 = vector.shape_cast %10 : vector<1x128x128xf32> to vector<128x128xf32>
    %cst_10 = arith.constant dense<0.000000e+00> : vector<16x128xf32>
    %12 = tpu.matmul %3, %11, %cst_10 {dimension_numbers = #tpu.dot_dimension_numbers<[1], [0], [0], [1], [0, 0, 1, 1], [], []>} : vector<16x128xf32>, vector<128x128xf32>, vector<16x128xf32> -> vector<16x128xf32>
    %c0_11 = arith.constant 0 : index
    %c0_12 = arith.constant 0 : index
    %13 = vector.load %arg6[%c0_11, %c0_12] : memref<1x128xf32, #tpu.memory_space<vmem>>, vector<1x128xf32>
    %14 = vector.broadcast %13 : vector<1x128xf32> to vector<16x128xf32>
    %15 = arith.addf %12, %14 : vector<16x128xf32>
    %cst_13 = arith.constant 5.000000e-01 : f32
    %16 = vector.broadcast %cst_13 : f32 to vector<16x128xf32>
    %17 = arith.mulf %16, %15 : vector<16x128xf32>
    %cst_14 = arith.constant 0.707106769 : f32
    %18 = vector.broadcast %cst_14 : f32 to vector<16x128xf32>
    %19 = arith.mulf %15, %18 : vector<16x128xf32>
    %20 = math.erf %19 : vector<16x128xf32>
    %cst_15 = arith.constant 1.000000e+00 : f32
    %21 = vector.broadcast %cst_15 : f32 to vector<16x128xf32>
    %22 = arith.addf %21, %20 : vector<16x128xf32>
    %23 = arith.mulf %17, %22 : vector<16x128xf32>
    %24 = arith.mulf %9, %23 : vector<16x128xf32>
    %c0_16 = arith.constant 0 : index
    %c0_17 = arith.constant 0 : index
    %25 = vector.load %arg10[%c0_16, %c0_17] : memref<16x128xf32, #tpu.memory_space<vmem>>, vector<16x128xf32>
    %c0_18 = arith.constant 0 : index
    %c0_19 = arith.constant 0 : index
    %26 = vector.load %arg7[%c0_18, %c0_19] : memref<128x128xf32, #tpu.memory_space<vmem>>, vector<128x128xf32>
    %cst_20 = arith.constant dense<0.000000e+00> : vector<16x128xf32>
    %27 = tpu.matmul %24, %26, %cst_20 {dimension_numbers = #tpu.dot_dimension_numbers<[1], [0], [0], [1], [0, 0, 1, 1], [], []>} : vector<16x128xf32>, vector<128x128xf32>, vector<16x128xf32> -> vector<16x128xf32>
    %28 = arith.addf %25, %27 : vector<16x128xf32>
    %c0_21 = arith.constant 0 : index
    %c0_22 = arith.constant 0 : index
    %29 = vector.load %arg10[%c0_21, %c0_22] : memref<16x128xf32, #tpu.memory_space<vmem>>, vector<16x128xf32>
    tpu.vector_store %arg10[%c0_21, %c0_22], %28 {strides = array<i32>} : memref<16x128xf32, #tpu.memory_space<vmem>>, vector<16x128xf32>,
    %c0_i32_23 = arith.constant 0 : i32
    %30 = arith.cmpi eq, %arg1, %c0_i32_23 : i32
    %31 = arith.extui %30 : i1 to i32
    %c0_i32_24 = arith.constant 0 : i32
    %32 = arith.cmpi ne, %31, %c0_i32_24 : i32
    scf.if %32 {
      %c0_25 = arith.constant 0 : index
      %c0_26 = arith.constant 0 : index
      %33 = vector.load %arg10[%c0_25, %c0_26] : memref<16x128xf32, #tpu.memory_space<vmem>>, vector<16x128xf32>
      %c0_27 = arith.constant 0 : index
      %c0_28 = arith.constant 0 : index
      %34 = vector.load %arg8[%c0_27, %c0_28] : memref<1x128xf32, #tpu.memory_space<vmem>>, vector<1x128xf32>
      %35 = vector.broadcast %34 : vector<1x128xf32> to vector<16x128xf32>
      %36 = arith.addf %33, %35 : vector<16x128xf32>
      %c0_29 = arith.constant 0 : index
      %c0_30 = arith.constant 0 : index
      %37 = vector.load %arg9[%c0_29, %c0_30] : memref<16x128xf32, #tpu.memory_space<vmem>>, vector<16x128xf32>
      tpu.vector_store %arg9[%c0_29, %c0_30], %36 {strides = array<i32>} : memref<16x128xf32, #tpu.memory_space<vmem>>, vector<16x128xf32>,
    } else {
    }
    return
  }
  func.func @transform_0(%arg0: i32, %arg1: i32) -> (i32, i32) {
    %c0_i32 = arith.constant 0 : i32
    %c0_i32_0 = arith.constant 0 : i32
    return %arg0, %c0_i32 : i32, i32
  }
  func.func @transform_1(%arg0: i32, %arg1: i32) -> (i32, i32, i32) {
    %c0_i32 = arith.constant 0 : i32
    %c0_i32_0 = arith.constant 0 : i32
    %c0_i32_1 = arith.constant 0 : i32
    return %arg1, %c0_i32, %c0_i32_0 : i32, i32, i32
  }
  func.func @transform_2(%arg0: i32, %arg1: i32) -> (i32, i32) {
    %c0_i32 = arith.constant 0 : i32
    %c0_i32_0 = arith.constant 0 : i32
    return %c0_i32, %arg1 : i32, i32
  }
  func.func @transform_3(%arg0: i32, %arg1: i32) -> (i32, i32, i32) {
    %c0_i32 = arith.constant 0 : i32
    %c0_i32_0 = arith.constant 0 : i32
    %c0_i32_1 = arith.constant 0 : i32
    return %arg1, %c0_i32, %c0_i32_0 : i32, i32, i32
  }
  func.func @transform_4(%arg0: i32, %arg1: i32) -> (i32, i32) {
    %c0_i32 = arith.constant 0 : i32
    %c0_i32_0 = arith.constant 0 : i32
    return %c0_i32, %arg1 : i32, i32
  }
  func.func @transform_5(%arg0: i32, %arg1: i32) -> (i32, i32) {
    %c0_i32 = arith.constant 0 : i32
    %c0_i32_0 = arith.constant 0 : i32
    return %arg1, %c0_i32 : i32, i32
  }
  func.func @transform_6(%arg0: i32, %arg1: i32) -> (i32, i32) {
    %c0_i32 = arith.constant 0 : i32
    %c0_i32_0 = arith.constant 0 : i32
    %c0_i32_1 = arith.constant 0 : i32
    return %c0_i32, %c0_i32_0 : i32, i32
  }
  func.func @transform_7(%arg0: i32, %arg1: i32) -> (i32, i32) {
    %c0_i32 = arith.constant 0 : i32
    %c0_i32_0 = arith.constant 0 : i32
    return %arg0, %c0_i32 : i32, i32
  }
}

</mosaic_0001>

<bundles_post_ra>
// kernel: tpu_custom_call.1
= control target key start
LH: loop header
LB: loop body
LE: loop exit
PB: predicated region body
PF: predicated region fallthrough
CT: control target
= control target key end

     0   :  { %12 = vsyncpa [#allocation4], 0  ;;  %s797_s0 = inlined_call_operand.hbm [shape: f32[16,128], index: 0, kind: input, shape index: {}]   ;;  %s798_s1 = inlined_call_operand.hbm [shape: f32[1,128,128], index: 1, kind: input, shape index: {}]   ;;  %s799_s2 = inlined_call_operand.vmem [shape: f32[1,128], index: 2, kind: input, shape index: {}]   ;;  %s800_s3 = inlined_call_operand.hbm [shape: f32[1,128,128], index: 3, kind: input, shape index: {}]   ;;  %s801_s4 = inlined_call_operand.vmem [shape: f32[1,128], index: 4, kind: input, shape index: {}]   ;;  %s802_s5 = inlined_call_operand.hbm [shape: f32[128,128], index: 5, kind: input, shape index: {}]   ;;  %s803_s6 = inlined_call_operand.vmem [shape: f32[1,128], index: 6, kind: input, shape index: {}]   ;;  %s804_s7 = inlined_call_operand.hbm [shape: f32[16,128], index: 7, kind: output, shape index: {}]  }
   0x1   :  { %13 = vsyncpa [#allocation7], 0 }
   0x2   :  { %14 = vsyncpa [#allocation10], 0 }
   0x3   :  { %15 = vsyncpa [#allocation5], 0  ;;  %s711_s24 = smov [#allocation6]   ;;  %s712_s26 = smov [#allocation3]  }
   0x4   :  { %s33_s25 = sshll.u32 %s711_s24, 4  ;;  %s21_s27 = sshll.u32 %s712_s26, 4  ;;  %s34_s25 = int_to_ptr.vmem [resolvable:$true] %s33_s25  ;;  %s22_s27 = int_to_ptr.vmem [resolvable:$true] %s21_s27 }
   0x5   :  { %s611_s28 = scalar_lea.vmem %s34_s25, 2048  ;;  %p616_p1 = scmp.lt.s32.totalorder %s34_s25, %s34_s25 }
   0x6   :  { %p612_p0 = scmp.ne.s32.totalorder %s34_s25, %s611_s28  ;;  %p617_p2 = scmp.lt.s32.totalorder %s611_s28, %s611_s28 }
   0x8   :  { %p618_p3 = por %p617_p2, %p616_p1 }
   0xa   :  { %p619_p4 = pnand %p618_p3, %p612_p0 }
   0xc   :  { %622 = shalt.err (!%p619_p4)
}
   0xd   :  { %s713_s29 = smov 128   ;;  %s714_s30 = smov 8  }
   0xe   :  { %39 = dma.hbm_to_vmem [thread:$0]  %s798_s1, 2048, %s34_s25, [#allocation7], %s713_s29, %s713_s29, %s714_s30  }
   0xf   :  { %s631_s10 = scalar_lea.vmem %s22_s27, 256  ;;  %p636_p6 = scmp.lt.s32.totalorder %s22_s27, %s22_s27 }
  0x10   :  { %p632_p5 = scmp.ne.s32.totalorder %s22_s27, %s631_s10  ;;  %p637_p7 = scmp.lt.s32.totalorder %s631_s10, %s631_s10 }
  0x12   :  { %p638_p8 = por %p637_p7, %p636_p6 }
  0x14   :  { %p639_p9 = pnand %p638_p8, %p632_p5 }
  0x16   :  { %642 = shalt.err (!%p639_p9)
}
  0x17   :  { %27 = dma.hbm_to_vmem [thread:$0]  %s797_s0, 256, %s22_s27, [#allocation4], %s713_s29, %s713_s29, %s714_s30  }
  0x18   :  { %s715_s13 = smov [#allocation8]   ;;  %s716_s15 = smov [#allocation9]  }
  0x19   :  { %s47_s14 = sshll.u32 %s715_s13, 4  ;;  %s61_s16 = sshll.u32 %s716_s15, 4  ;;  %s48_s14 = int_to_ptr.vmem [resolvable:$true] %s47_s14  ;;  %s62_s16 = int_to_ptr.vmem [resolvable:$true] %s61_s16 }
  0x1a   :  { %s651_s1 = scalar_lea.vmem %s48_s14, 2048  ;;  %p656_p11 = scmp.lt.s32.totalorder %s48_s14, %s48_s14 }
  0x1b   :  { %p652_p10 = scmp.ne.s32.totalorder %s48_s14, %s651_s1  ;;  %p657_p12 = scmp.lt.s32.totalorder %s651_s1, %s651_s1 }
  0x1d   :  { %p658_p13 = por %p657_p12, %p656_p11 }
  0x1f   :  { %p659_p0 = pnand %p658_p13, %p652_p10 }
  0x21   :  { %662 = shalt.err (!%p659_p0)
}
  0x22   :  { %53 = dma.hbm_to_vmem [thread:$0]  %s800_s3, 2048, %s48_s14, [#allocation7], %s713_s29, %s713_s29, %s714_s30  }
  0x23   :  { %s671_s0 = scalar_lea.vmem %s62_s16, 2048  ;;  %p676_p2 = scmp.lt.s32.totalorder %s62_s16, %s62_s16 }
  0x24   :  { %p672_p1 = scmp.ne.s32.totalorder %s62_s16, %s671_s0  ;;  %p677_p3 = scmp.lt.s32.totalorder %s671_s0, %s671_s0 }
  0x26   :  { %p678_p4 = por %p677_p3, %p676_p2 }
  0x28   :  { %p679_p5 = pnand %p678_p4, %p672_p1 }
  0x2a   :  { %682 = shalt.err (!%p679_p5)
}
  0x2b   :  { %67 = dma.hbm_to_vmem [thread:$0]  %s802_s5, 2048, %s62_s16, [#allocation10], %s713_s29, %s713_s29, %s714_s30  }
  0x2c   :  { %703 = dma.done.wait [#allocation4], 256  }
  0x2d   :  { %704 = vsyncadd [#allocation4], 4294967040 }
  0x2e   :  { %705 = dma.done.wait [#allocation7], 4096  }
  0x2f   :  { %706 = vsyncadd [#allocation7], 4294963200 }
  0x30   :  { %707 = dma.done.wait [#allocation10], 2048  }
  0x31   :  { %708 = vsyncadd [#allocation10], 4294965248  ;;  %v203_v0 = vld [vmem:[#allocation8 + $0x78] sm:$0xff]  ;;  %v202_v1 = vld [vmem:[#allocation8 + $0x70] sm:$0xff] }
  0x32   :  { %522 = vmatprep.subr.mxu1 %v203_v0  ;;  %v201_v2 = vld [vmem:[#allocation8 + $0x68] sm:$0xff]  ;;  %v105_v3 = vld [vmem:[#allocation6 + $0x78] sm:$0xff]  ;;  %v104_v4 = vld [vmem:[#allocation6 + $0x70] sm:$0xff] }
  0x33   :  { %523 = vmatpush3.msra.mxu1 %v203_v0  ;;  %v200_v5 = vld [vmem:[#allocation8 + $0x60] sm:$0xff]  ;;  %487 = vmatprep.subr.mxu0 %v105_v3  ;;  %v103_v6 = vld [vmem:[#allocation6 + $0x68] sm:$0xff]  ;;  %v199_v7 = vld [vmem:[#allocation8 + $0x58] sm:$0xff] }
  0x34   :  { %524 = vmatprep.subr.mxu1 %v202_v1  ;;  %488 = vmatpush3.msra.mxu0 %v105_v3  ;;  %v102_v8 = vld [vmem:[#allocation6 + $0x60] sm:$0xff]  ;;  %v198_v9 = vld [vmem:[#allocation8 + $0x50] sm:$0xff]  ;;  %v101_v10 = vld [vmem:[#allocation6 + $0x58] sm:$0xff] }
  0x35   :  { %525 = vmatpush3.msra.mxu1 %v202_v1  ;;  %489 = vmatprep.subr.mxu0 %v104_v4  ;;  %v197_v11 = vld [vmem:[#allocation8 + $0x48] sm:$0xff]  ;;  %v100_v12 = vld [vmem:[#allocation6 + $0x50] sm:$0xff]  ;;  %v196_v13 = vld [vmem:[#allocation8 + $0x40] sm:$0xff] }
  0x36   :  { %526 = vmatprep.subr.mxu1 %v201_v2  ;;  %490 = vmatpush3.msra.mxu0 %v104_v4  ;;  %v99_v14 = vld [vmem:[#allocation6 + $0x48] sm:$0xff]  ;;  %v195_v15 = vld [vmem:[#allocation8 + $0x38] sm:$0xff]  ;;  %v88_v16 = vld [vmem:[#allocation3] sm:$0xff] }
  0x37   :  { %527 = vmatpush3.msra.mxu1 %v201_v2  ;;  %491 = vmatprep.subr.mxu0 %v103_v6  ;;  %v194_v17 = vld [vmem:[#allocation8 + $0x30] sm:$0xff]  ;;  %v98_v18 = vld [vmem:[#allocation6 + $0x40] sm:$0xff]  ;;  %v193_v19 = vld [vmem:[#allocation8 + $0x28] sm:$0xff] }
  0x38   :  { %528 = vmatprep.subr.mxu1 %v200_v5  ;;  %492 = vmatpush3.msra.mxu0 %v103_v6  ;;  %v97_v20 = vld [vmem:[#allocation6 + $0x38] sm:$0xff]  ;;  %v192_v21 = vld [vmem:[#allocation8 + $0x20] sm:$0xff]  ;;  %v96_v22 = vld [vmem:[#allocation6 + $0x30] sm:$0xff] }
  0x39   :  { %529 = vmatpush3.msra.mxu1 %v200_v5  ;;  %493 = vmatprep.subr.mxu0 %v102_v8  ;;  %v191_v23 = vld [vmem:[#allocation8 + $0x18] sm:$0xff]  ;;  %v95_v24 = vld [vmem:[#allocation6 + $0x28] sm:$0xff]  ;;  %v190_v25 = vld [vmem:[#allocation8 + $0x10] sm:$0xff] }
  0x3a   :  { %530 = vmatprep.subr.mxu1 %v199_v7  ;;  %494 = vmatpush3.msra.mxu0 %v102_v8  ;;  %v94_v26 = vld [vmem:[#allocation6 + $0x20] sm:$0xff]  ;;  %v189_v27 = vld [vmem:[#allocation8 + $0x8] sm:$0xff]  ;;  %v93_v28 = vld [vmem:[#allocation6 + $0x18] sm:$0xff] }
  0x3b   :  { %531 = vmatpush3.msra.mxu1 %v199_v7  ;;  %495 = vmatprep.subr.mxu0 %v101_v10  ;;  %v188_v29 = vld [vmem:[#allocation8] sm:$0xff]  ;;  %v92_v30 = vld [vmem:[#allocation6 + $0x10] sm:$0xff]  ;;  %v89_v31 = vld [vmem:[#allocation3 + $0x8] sm:$0xff] }
  0x3c   :  { %532 = vmatprep.subr.mxu1 %v198_v9  ;;  %496 = vmatpush3.msra.mxu0 %v101_v10  ;;  %v91_v32 = vld [vmem:[#allocation6 + $0x8] sm:$0xff]  ;;  %v90_v33 = vld [vmem:[#allocation6] sm:$0xff]  ;;  %v315_v34 = vld [vmem:[#allocation9 + $0x78] sm:$0xff] }
  0x3d   :  { %533 = vmatpush3.msra.mxu1 %v198_v9  ;;  %497 = vmatprep.subr.mxu0 %v100_v12  ;;  %v314_v35 = vld [vmem:[#allocation9 + $0x70] sm:$0xff]  ;;  %v313_v36 = vld [vmem:[#allocation9 + $0x68] sm:$0xff]  ;;  %v312_v37 = vld [vmem:[#allocation9 + $0x60] sm:$0xff] }
  0x3e   :  { %534 = vmatprep.subr.mxu1 %v197_v11  ;;  %498 = vmatpush3.msra.mxu0 %v100_v12  ;;  %v311_v38 = vld [vmem:[#allocation9 + $0x58] sm:$0xff]  ;;  %v310_v39 = vld [vmem:[#allocation9 + $0x50] sm:$0xff]  ;;  %v309_v40 = vld [vmem:[#allocation9 + $0x48] sm:$0xff] }
  0x3f   :  { %535 = vmatpush3.msra.mxu1 %v197_v11  ;;  %499 = vmatprep.subr.mxu0 %v99_v14  ;;  %v308_v41 = vld [vmem:[#allocation9 + $0x40] sm:$0xff]  ;;  %v307_v42 = vld [vmem:[#allocation9 + $0x38] sm:$0xff]  ;;  %v306_v43 = vld [vmem:[#allocation9 + $0x30] sm:$0xff] }
  0x40   :  { %536 = vmatprep.subr.mxu1 %v196_v13  ;;  %500 = vmatpush3.msra.mxu0 %v99_v14  ;;  %v305_v44 = vld [vmem:[#allocation9 + $0x28] sm:$0xff]  ;;  %v304_v45 = vld [vmem:[#allocation9 + $0x20] sm:$0xff]  ;;  %v303_v46 = vld [vmem:[#allocation9 + $0x18] sm:$0xff] }
  0x41   :  { %537 = vmatpush3.msra.mxu1 %v196_v13  ;;  %554 = vmatprep.mubr.f32.mxu1 %v88_v16  ;;  %v302_v47 = vld [vmem:[#allocation9 + $0x10] sm:$0xff]  ;;  %v301_v48 = vld [vmem:[#allocation9 + $0x8] sm:$0xff]  ;;  %v300_v49 = vld [vmem:[#allocation9] sm:$0xff] }
  0x42   :  { %538 = vmatprep.subr.mxu1 %v195_v15  ;;  %501 = vmatprep.subr.mxu0 %v98_v18  ;;  %v431_v50 = vld [vmem:[%s801_s4] ss:$0 sm:$0xff] }
  0x43   :  { %539 = vmatpush3.msra.mxu1 %v195_v15  ;;  %502 = vmatpush3.msra.mxu0 %v98_v18  ;;  %v430_v59 = vld [vmem:[%s799_s2] ss:$0 sm:$0xff]  ;;  %s717_s2 = smov [#allocation11]  }
  0x44   :  { %540 = vmatprep.subr.mxu1 %v194_v17  ;;  %503 = vmatprep.subr.mxu0 %v97_v20  ;;  %v432_v8 = vld [vmem:[%s803_s6] ss:$0 sm:$0xff]  ;;  %s416_s24 = sshll.u32 %s717_s2, 4  ;;  %s417_s24 = int_to_ptr.vmem [resolvable:$true] %s416_s24 }
  0x45   :  { %541 = vmatpush3.msra.mxu1 %v194_v17  ;;  %504 = vmatpush3.msra.mxu0 %v97_v20  ;;  %s683_s25 = scalar_lea.vmem %s417_s24, 256  ;;  %p688_p7 = scmp.lt.s32.totalorder %s417_s24, %s417_s24 }
  0x46   :  { %542 = vmatprep.subr.mxu1 %v193_v19  ;;  %505 = vmatprep.subr.mxu0 %v96_v22  ;;  %p684_p6 = scmp.ne.s32.totalorder %s417_s24, %s683_s25  ;;  %p689_p8 = scmp.lt.s32.totalorder %s683_s25, %s683_s25 }
  0x47   :  { %543 = vmatpush3.msra.mxu1 %v193_v19  ;;  %506 = vmatpush3.msra.mxu0 %v96_v22 }
  0x48   :  { %544 = vmatprep.subr.mxu1 %v192_v21  ;;  %507 = vmatprep.subr.mxu0 %v95_v24  ;;  %p690_p9 = por %p689_p8, %p688_p7 }
  0x49   :  { %545 = vmatpush3.msra.mxu1 %v192_v21  ;;  %508 = vmatpush3.msra.mxu0 %v95_v24 }
  0x4a   :  { %546 = vmatprep.subr.mxu1 %v191_v23  ;;  %509 = vmatprep.subr.mxu0 %v94_v26  ;;  %p691_p10 = pnand %p690_p9, %p684_p6 }
  0x4b   :  { %547 = vmatpush3.msra.mxu1 %v191_v23  ;;  %510 = vmatpush3.msra.mxu0 %v94_v26 }
  0x4c   :  { %548 = vmatprep.subr.mxu1 %v190_v25  ;;  %511 = vmatprep.subr.mxu0 %v93_v28 }
  0x4d   :  { %549 = vmatpush3.msra.mxu1 %v190_v25  ;;  %512 = vmatpush3.msra.mxu0 %v93_v28 }
  0x4e   :  { %550 = vmatprep.subr.mxu1 %v189_v27  ;;  %513 = vmatprep.subr.mxu0 %v92_v30 }
  0x4f   :  { %551 = vmatpush3.msra.mxu1 %v189_v27  ;;  %514 = vmatpush3.msra.mxu0 %v92_v30 }
  0x50   :  { %552 = vmatprep.subr.mxu1 %v188_v29  ;;  %515 = vmatprep.subr.mxu0 %v91_v32 }
  0x51   :  { %553 = vmatpush3.msra.mxu1 %v188_v29  ;;  %516 = vmatpush3.msra.mxu0 %v91_v32 }
  0x52   :  { %555 = vmatmul.mubr.f32.vlgmr.msra.gmra.mxu1 %v89_v31  ;;  %519 = vmatprep.mubr.f32.mxu0 %v88_v16 }
  0x53   :  { %517 = vmatprep.subr.mxu0 %v90_v33 }
  0x54   :  { %518 = vmatpush3.msra.mxu0 %v90_v33 }
  0x55   :  { %520 = vmatmul.mubr.f32.vlgmr.msra.gmra.mxu0 %v89_v31  ;;  %557 = vmatprep.subr.mxu0 %v315_v34 }
  0x56   :  { %558 = vmatpush3.msra.mxu0 %v315_v34 }
  0x57   :  { %559 = vmatprep.subr.mxu0 %v314_v35 }
  0x58   :  { %560 = vmatpush3.msra.mxu0 %v314_v35 }
  0x59   :  { %561 = vmatprep.subr.mxu0 %v313_v36 }
  0x5a   :  { %562 = vmatpush3.msra.mxu0 %v313_v36 }
  0x5b   :  { %563 = vmatprep.subr.mxu0 %v312_v37 }
  0x5c   :  { %564 = vmatpush3.msra.mxu0 %v312_v37 }
  0x5d   :  { %565 = vmatprep.subr.mxu0 %v311_v38 }
  0x5e   :  { %566 = vmatpush3.msra.mxu0 %v311_v38 }
  0x5f   :  { %567 = vmatprep.subr.mxu0 %v310_v39 }
  0x60   :  { %568 = vmatpush3.msra.mxu0 %v310_v39 }
  0x61   :  { %569 = vmatprep.subr.mxu0 %v309_v40 }
  0x62   :  { %570 = vmatpush3.msra.mxu0 %v309_v40 }
  0x63   :  { %571 = vmatprep.subr.mxu0 %v308_v41 }
  0x64   :  { %572 = vmatpush3.msra.mxu0 %v308_v41 }
  0x65   :  { %573 = vmatprep.subr.mxu0 %v307_v42 }
  0x66   :  { %574 = vmatpush3.msra.mxu0 %v307_v42 }
  0x67   :  { %575 = vmatprep.subr.mxu0 %v306_v43 }
  0x68   :  { %576 = vmatpush3.msra.mxu0 %v306_v43 }
  0x69   :  { %577 = vmatprep.subr.mxu0 %v305_v44 }
  0x6a   :  { %578 = vmatpush3.msra.mxu0 %v305_v44 }
  0x6b   :  { %579 = vmatprep.subr.mxu0 %v304_v45 }
  0x6c   :  { %580 = vmatpush3.msra.mxu0 %v304_v45 }
  0x6d   :  { %581 = vmatprep.subr.mxu0 %v303_v46 }
  0x6e   :  { %582 = vmatpush3.msra.mxu0 %v303_v46 }
  0x6f   :  { %583 = vmatprep.subr.mxu0 %v302_v47 }
  0x70   :  { %584 = vmatpush3.msra.mxu0 %v302_v47 }
  0x71   :  { %585 = vmatprep.subr.mxu0 %v301_v48 }
  0x72   :  { %586 = vmatpush3.msra.mxu0 %v301_v48 }
  0x73   :  { %587 = vmatprep.subr.mxu0 %v300_v49 }
  0x74   :  { %588 = vmatpush3.msra.mxu0 %v300_v49 }
 0x112   :  { %v556_v51 = vpop.f32.mrf.mxu1 }
 0x113   :  { %v283_v52 = vadd.f32 %v556_v51, %v431_v50 }
 0x114   :  { %v277_v53 = vpop.f32.mrf.mxu1 }
 0x115   :  { %v289_v54 = vmul.f32 0.70710677, %v283_v52  ;;  %v278_v55 = vadd.f32 %v431_v50, %v277_v53  ;;  %v521_v57 = vpop.f32.mrf.mxu0  ;;  %v287_v62 = vmul.f32 0.5, %v283_v52 }
 0x116   :  { %v185_v2 = vadd.f32 %v521_v57, %v430_v59 }
 0x117   :  { %599 = verf.f32 %v289_v54  ;;  %v288_v56 = vmul.f32 0.70710677, %v278_v55  ;;  %v179_v63 = vpop.f32.mrf.mxu0  ;;  %v286_v0 = vmul.f32 0.5, %v278_v55 }
 0x118   :  { %v180_v4 = vadd.f32 %v430_v59, %v179_v63 }
 0x119   :  { %601 = verf.f32 %v288_v56 }
 0x124   :  { %v600_v58 = vpop.eup %599 }
 0x125   :  { %v293_v60 = vadd.f32 1.0, %v600_v58 }
 0x126   :  { %v602_v61 = vpop.eup %601 }
 0x127   :  { %v292_v1 = vadd.f32 1.0, %v602_v61  ;;  %v295_v3 = vmul.f32 %v293_v60, %v287_v62 }
 0x129   :  { %v294_v5 = vmul.f32 %v292_v1, %v286_v0  ;;  %v297_v7 = vmul.f32 %v295_v3, %v185_v2 }
 0x12b   :  { %v296_v6 = vmul.f32 %v294_v5, %v180_v4 }
 0x12d   :  { %589 = vmatprep.mubr.f32.mxu0 %v296_v6 }
 0x12e   :  { %590 = vmatmul.mubr.f32.vlgmr.msra.gmra.mxu0 %v297_v7 }
 0x1ee   :  { %v591_v9 = vpop.f32.mrf.mxu0 }
 0x1ef   :  { %v408_v10 = vadd.f32 %v591_v9, %v432_v8 }
 0x1f0   :  { %v382_v11 = vpop.f32.mrf.mxu0 }
 0x1f1   :  { %410 = vst [vmem:[#allocation11 + $0x8] sm:$0xff] %v408_v10  ;;  %v407_v12 = vadd.f32 %v432_v8, %v382_v11 }
 0x1f3   :  { %409 = vst [vmem:[#allocation11] sm:$0xff] %v407_v12 }
 0x1f4   :  { %694 = shalt.err (!%p691_p10)
}
 0x1f5   :  { %422 = dma.vmem_to_hbm [thread:$0]  %s417_s24, 256, %s804_s7, [#allocation5], %s713_s29, %s713_s29, %s714_s30  }
 0x1f6   :  { %709 = dma.done.wait [#allocation5], 256  }
 0x1f7   :  { %710 = vsyncadd [#allocation5], 4294967040 }
 0x1f8   :  { %426 = vsyncpa [#allocation4], 1 }
 0x1f9   :  { %427 = vsyncpa [#allocation7], 1 }
 0x1fa   :  { %428 = vsyncpa [#allocation10], 1 }
 0x1fb   :  { %429 = vsyncpa [#allocation5], 1 }

</bundles_post_ra>
